<compile_context>
chip_gen: v5e
topology: v5e:2x2
jax: 0.10.0
libtpu: 0.0.40
codegen_flags: <defaults>
</compile_context>

<pallas_src>
import jax
import jax.numpy as jnp
from jax import lax
from jax.experimental import pallas as pl
from jax.experimental.pallas import tpu as pltpu


def _mlp_kernel(x_ref, w1_ref, b1_ref, w2_ref, b2_ref, w3_ref, b3_ref, o_ref):
    # x_ref: (TB, 11).  All compute keeps the batch on the 128-lane axis.

    # Layer 1: Linear(11 -> 20) + ReLU, computed as W1 @ x^T.
    # Contract the last dim of both operands (the q @ k^T attention pattern),
    # so no explicit transpose of the big (TB, 11) tile is materialized.
    h1 = lax.dot_general(
        w1_ref[...], x_ref[...],
        dimension_numbers=(((1,), (1,)), ((), ())),
        preferred_element_type=jnp.float32)                      # (20, TB)
    h1 = jnp.maximum(h1 + b1_ref[...], 0.0)                       # b1: (20, 1)

    # Layer 2: Linear(20 -> 2) + ReLU (canonical [M,K]x[K,N] MXU matmul).
    h2 = jnp.dot(w2_ref[...], h1, preferred_element_type=jnp.float32)  # (2, TB)
    h2 = jnp.maximum(h2 + b2_ref[...], 0.0)                       # b2: (2, 1)

    # Layer 3: Linear(2 -> 1) + Sigmoid — pure VPU, no MXU round trip.
    w3 = w3_ref[...]                                              # (1, 2)
    z = h2[0:1, :] * w3[:, 0:1] + h2[1:2, :] * w3[:, 1:2] + b3_ref[...]
    o_ref[...] = jax.nn.sigmoid(z)                                # (1, TB) lane-dense


def _round_up(n, m):
    return ((n + m - 1) // m) * m


def _default_tile_rows():
    """Pick the batch tile from the generation's VMEM budget.

    ~32K rows on 128 MiB-VMEM parts (v5e/v6e), ~16K rows on 64 MiB parts
    (v7x).  Falls back to the conservative 16K if the query is unavailable.
    """
    try:
        vmem = pltpu.get_tpu_info().vmem_capacity_bytes
    except Exception:  # pragma: no cover - hardware-query fallback
        vmem = 64 << 20
    return 32768 if vmem >= (96 << 20) else 16384


def dnn_forward(x, params, *, tile_b=None):
    """Fused MLP forward.  x: (B, 11) float32 -> (B, 1) float32."""
    w1, b1, w2, b2, w3, b3 = params
    B = x.shape[0]

    if tile_b is None:
        tile_b = _default_tile_rows()
    # Tile must be a multiple of 128 so the lane-dense (1, tb) output block is
    # legal/unmasked; clamp to the (128-rounded) batch so a single ragged
    # block covers tiny inputs.
    tb = min(max(128, _round_up(tile_b, 128)), _round_up(B, 128))
    grid = pl.cdiv(B, tb)  # ragged last block handled by Pallas OOB masking

    # Double-buffered lane-padded input tile (tb*512 B per buffer) + headroom
    # for the output block, resident weights and kernel intermediates.
    vmem_limit = 2 * tb * 512 + (24 << 20)

    resident = lambda a: pl.BlockSpec(a.shape, lambda i: (0, 0))

    out = pl.pallas_call(
        _mlp_kernel,
        out_shape=jax.ShapeDtypeStruct((1, B), jnp.float32),
        grid=(grid,),
        in_specs=[
            pl.BlockSpec((tb, 11), lambda i: (i, 0)),   # batch-tiled input
            resident(w1), resident(b1),                 # weights stay in VMEM
            resident(w2), resident(b2),
            resident(w3), resident(b3),
        ],
        out_specs=pl.BlockSpec((1, tb), lambda i: (0, i)),  # lane-dense output
        compiler_params=pltpu.CompilerParams(
            dimension_semantics=("parallel",),          # megacore on v7x
            vmem_limit_bytes=int(vmem_limit)),
    )(x, w1, b1, w2, b2, w3, b3)

    # (1, B) lane-dense slab -> (B, 1) column, matching the PyTorch module.
    return out.reshape(B, 1)


def init_params(key):
    """Deterministic init mimicking PyTorch nn.Linear default:
    U(-1/sqrt(fan_in), 1/sqrt(fan_in)).  Weights stored as (out, in)."""
    def linear(key, fan_in, fan_out):
        kw, kb = jax.random.split(key)
        bound = 1.0 / jnp.sqrt(float(fan_in))
        w = jax.random.uniform(kw, (fan_out, fan_in), jnp.float32, -bound, bound)
        b = jax.random.uniform(kb, (fan_out, 1), jnp.float32, -bound, bound)
        return w, b

    k1, k2, k3 = jax.random.split(key, 3)
    w1, b1 = linear(k1, 11, 20)
    w2, b2 = linear(k2, 20, 2)
    w3, b3 = linear(k3, 2, 1)
    return (w1, b1, w2, b2, w3, b3)


def dnn_reference(x, params):
    """Pure-JAX reference (standard row-major orientation)."""
    w1, b1, w2, b2, w3, b3 = params
    h1 = jnp.maximum(x @ w1.T + b1[:, 0], 0.0)
    h2 = jnp.maximum(h1 @ w2.T + b2[:, 0], 0.0)
    return jax.nn.sigmoid(h2 @ w3.T + b3[:, 0])


if __name__ == "__main__":
    key = jax.random.PRNGKey(0)
    kx, kx2, kp = jax.random.split(key, 3)
    params = init_params(kp)

    # Small test: single grid step whose block is ragged (8 valid rows of a
    # 128-row block); exercises OOB-read / masked-store handling.
    B = 8
    x = jax.random.normal(kx, (B, 11), dtype=jnp.float32)
    out = jax.block_until_ready(dnn_forward(x, params))
    ref = dnn_reference(x, params)
    assert out.shape == (B, 1), out.shape
    assert jnp.allclose(out, ref, atol=1e-5, rtol=1e-5), (out, ref)

    # Second test: multi-step pipelined grid with a ragged trailing block and
    # no wrapper-side padding of x.
    B2 = 300
    x2 = jax.random.normal(kx2, (B2, 11), dtype=jnp.float32)
    out2 = jax.block_until_ready(dnn_forward(x2, params, tile_b=128))
    ref2 = dnn_reference(x2, params)
    assert out2.shape == (B2, 1), out2.shape
    assert jnp.allclose(out2, ref2, atol=1e-5, rtol=1e-5)

    # Third test: default (large) tile path with a non-multiple-of-128 batch.
    B3 = 1000
    x3 = jax.random.normal(jax.random.PRNGKey(3), (B3, 11), dtype=jnp.float32)
    out3 = jax.block_until_ready(dnn_forward(x3, params))
    ref3 = dnn_reference(x3, params)
    assert out3.shape == (B3, 1), out3.shape
    assert jnp.allclose(out3, ref3, atol=1e-5, rtol=1e-5)

    print("KERNEL_OK")
</pallas_src>

<mosaic_0001>
module attributes {stable_mosaic.version = 11 : i64} {
  func.func @_mlp_kernel(%arg0: i32, %arg1: memref<128x11xf32, #tpu.memory_space<vmem>>, %arg2: memref<20x11xf32, #tpu.memory_space<vmem>>, %arg3: memref<20x1xf32, #tpu.memory_space<vmem>>, %arg4: memref<2x20xf32, #tpu.memory_space<vmem>>, %arg5: memref<2x1xf32, #tpu.memory_space<vmem>>, %arg6: memref<1x2xf32, #tpu.memory_space<vmem>>, %arg7: memref<1x1xf32, #tpu.memory_space<vmem>>, %arg8: memref<1x128xf32, #tpu.memory_space<vmem>>) attributes {dimension_semantics = [#tpu.dimension_semantics<parallel>], iteration_bounds = array<i64: 1>, scalar_prefetch = 0 : i64, scratch_operands = 0 : i64, tpu.core_type = #tpu.core_type<tc>, window_params = [{transform_indices = @transform_0, window_bounds = array<i64: 128, 11>}, {pipeline_mode = #tpu.pipeline_mode<synchronous>, transform_indices = @transform_1, window_bounds = array<i64: 20, 11>}, {pipeline_mode = #tpu.pipeline_mode<synchronous>, transform_indices = @transform_2, window_bounds = array<i64: 20, 1>}, {pipeline_mode = #tpu.pipeline_mode<synchronous>, transform_indices = @transform_3, window_bounds = array<i64: 2, 20>}, {pipeline_mode = #tpu.pipeline_mode<synchronous>, transform_indices = @transform_4, window_bounds = array<i64: 2, 1>}, {pipeline_mode = #tpu.pipeline_mode<synchronous>, transform_indices = @transform_5, window_bounds = array<i64: 1, 2>}, {pipeline_mode = #tpu.pipeline_mode<synchronous>, transform_indices = @transform_6, window_bounds = array<i64: 1, 1>}, {transform_indices = @transform_7, window_bounds = array<i64: 1, 128>}]} {
    %c0 = arith.constant 0 : index
    %c0_0 = arith.constant 0 : index
    %0 = vector.load %arg2[%c0, %c0_0] : memref<20x11xf32, #tpu.memory_space<vmem>>, vector<20x11xf32>
    %c0_1 = arith.constant 0 : index
    %c0_2 = arith.constant 0 : index
    %1 = vector.load %arg1[%c0_1, %c0_2] : memref<128x11xf32, #tpu.memory_space<vmem>>, vector<128x11xf32>
    %cst = arith.constant dense<0.000000e+00> : vector<20x128xf32>
    %2 = tpu.matmul %0, %1, %cst {dimension_numbers = #tpu.dot_dimension_numbers<[1], [1], [0], [0], [0, 0, 1, 0], [], []>} : vector<20x11xf32>, vector<128x11xf32>, vector<20x128xf32> -> vector<20x128xf32>
    %c0_3 = arith.constant 0 : index
    %c0_4 = arith.constant 0 : index
    %3 = vector.load %arg3[%c0_3, %c0_4] : memref<20x1xf32, #tpu.memory_space<vmem>>, vector<20x1xf32>
    %4 = vector.broadcast %3 : vector<20x1xf32> to vector<20x128xf32>
    %5 = arith.addf %2, %4 : vector<20x128xf32>
    %cst_5 = arith.constant 0.000000e+00 : f32
    %6 = vector.broadcast %cst_5 : f32 to vector<20x128xf32>
    %7 = arith.maximumf %5, %6 : vector<20x128xf32>
    %c0_6 = arith.constant 0 : index
    %c0_7 = arith.constant 0 : index
    %8 = vector.load %arg4[%c0_6, %c0_7] : memref<2x20xf32, #tpu.memory_space<vmem>>, vector<2x20xf32>
    %cst_8 = arith.constant dense<0.000000e+00> : vector<2x128xf32>
    %9 = tpu.matmul %8, %7, %cst_8 {dimension_numbers = #tpu.dot_dimension_numbers<[1], [0], [0], [1], [0, 0, 1, 1], [], []>} : vector<2x20xf32>, vector<20x128xf32>, vector<2x128xf32> -> vector<2x128xf32>
    %c0_9 = arith.constant 0 : index
    %c0_10 = arith.constant 0 : index
    %10 = vector.load %arg5[%c0_9, %c0_10] : memref<2x1xf32, #tpu.memory_space<vmem>>, vector<2x1xf32>
    %11 = vector.broadcast %10 : vector<2x1xf32> to vector<2x128xf32>
    %12 = arith.addf %9, %11 : vector<2x128xf32>
    %cst_11 = arith.constant 0.000000e+00 : f32
    %13 = vector.broadcast %cst_11 : f32 to vector<2x128xf32>
    %14 = arith.maximumf %12, %13 : vector<2x128xf32>
    %c0_12 = arith.constant 0 : index
    %c0_13 = arith.constant 0 : index
    %15 = vector.load %arg6[%c0_12, %c0_13] : memref<1x2xf32, #tpu.memory_space<vmem>>, vector<1x2xf32>
    %16 = vector.extract_strided_slice %14 {offsets = [0, 0], sizes = [1, 128], strides = [1, 1]} : vector<2x128xf32> to vector<1x128xf32>
    %17 = vector.extract_strided_slice %15 {offsets = [0, 0], sizes = [1, 1], strides = [1, 1]} : vector<1x2xf32> to vector<1x1xf32>
    %18 = vector.broadcast %17 : vector<1x1xf32> to vector<1x128xf32>
    %19 = arith.mulf %16, %18 : vector<1x128xf32>
    %20 = vector.extract_strided_slice %14 {offsets = [1, 0], sizes = [1, 128], strides = [1, 1]} : vector<2x128xf32> to vector<1x128xf32>
    %21 = vector.extract_strided_slice %15 {offsets = [0, 1], sizes = [1, 1], strides = [1, 1]} : vector<1x2xf32> to vector<1x1xf32>
    %22 = vector.broadcast %21 : vector<1x1xf32> to vector<1x128xf32>
    %23 = arith.mulf %20, %22 : vector<1x128xf32>
    %24 = arith.addf %19, %23 : vector<1x128xf32>
    %c0_14 = arith.constant 0 : index
    %c0_15 = arith.constant 0 : index
    %25 = vector.load %arg7[%c0_14, %c0_15] : memref<1x1xf32, #tpu.memory_space<vmem>>, vector<1x1xf32>
    %26 = vector.broadcast %25 : vector<1x1xf32> to vector<1x128xf32>
    %27 = arith.addf %24, %26 : vector<1x128xf32>
    %28 = arith.negf %27 : vector<1x128xf32>
    %29 = math.exp %28 : vector<1x128xf32>
    %cst_16 = arith.constant 1.000000e+00 : f32
    %30 = vector.broadcast %cst_16 : f32 to vector<1x128xf32>
    %31 = arith.addf %30, %29 : vector<1x128xf32>
    %32 = arith.divf %30, %31 : vector<1x128xf32>
    %c0_17 = arith.constant 0 : index
    %c0_18 = arith.constant 0 : index
    %33 = vector.load %arg8[%c0_17, %c0_18] : memref<1x128xf32, #tpu.memory_space<vmem>>, vector<1x128xf32>
    tpu.vector_store %arg8[%c0_17, %c0_18], %32 {strides = array<i32>} : memref<1x128xf32, #tpu.memory_space<vmem>>, vector<1x128xf32>,
    return
  }
  func.func @transform_0(%arg0: i32) -> (i32, i32) {
    %c0_i32 = arith.constant 0 : i32
    %c0_i32_0 = arith.constant 0 : i32
    return %arg0, %c0_i32 : i32, i32
  }
  func.func @transform_1(%arg0: i32) -> (i32, i32) {
    %c0_i32 = arith.constant 0 : i32
    %c0_i32_0 = arith.constant 0 : i32
    %c0_i32_1 = arith.constant 0 : i32
    return %c0_i32, %c0_i32_0 : i32, i32
  }
  func.func @transform_2(%arg0: i32) -> (i32, i32) {
    %c0_i32 = arith.constant 0 : i32
    %c0_i32_0 = arith.constant 0 : i32
    %c0_i32_1 = arith.constant 0 : i32
    return %c0_i32, %c0_i32_0 : i32, i32
  }
  func.func @transform_3(%arg0: i32) -> (i32, i32) {
    %c0_i32 = arith.constant 0 : i32
    %c0_i32_0 = arith.constant 0 : i32
    %c0_i32_1 = arith.constant 0 : i32
    return %c0_i32, %c0_i32_0 : i32, i32
  }
  func.func @transform_4(%arg0: i32) -> (i32, i32) {
    %c0_i32 = arith.constant 0 : i32
    %c0_i32_0 = arith.constant 0 : i32
    %c0_i32_1 = arith.constant 0 : i32
    return %c0_i32, %c0_i32_0 : i32, i32
  }
  func.func @transform_5(%arg0: i32) -> (i32, i32) {
    %c0_i32 = arith.constant 0 : i32
    %c0_i32_0 = arith.constant 0 : i32
    %c0_i32_1 = arith.constant 0 : i32
    return %c0_i32, %c0_i32_0 : i32, i32
  }
  func.func @transform_6(%arg0: i32) -> (i32, i32) {
    %c0_i32 = arith.constant 0 : i32
    %c0_i32_0 = arith.constant 0 : i32
    %c0_i32_1 = arith.constant 0 : i32
    return %c0_i32, %c0_i32_0 : i32, i32
  }
  func.func @transform_7(%arg0: i32) -> (i32, i32) {
    %c0_i32 = arith.constant 0 : i32
    %c0_i32_0 = arith.constant 0 : i32
    return %c0_i32, %arg0 : i32, i32
  }
}

</mosaic_0001>

<bundles_post_ra>
// kernel: tpu_custom_call.1
= control target key start
LH: loop header
LB: loop body
LE: loop exit
PB: predicated region body
PF: predicated region fallthrough
CT: control target
= control target key end

     0   :  { %s517_s0 = inlined_call_operand.vmem [shape: f32[8,11], index: 0, kind: input, shape index: {}]   ;;  %s518_s1 = inlined_call_operand.vmem [shape: f32[20,11], index: 1, kind: input, shape index: {}]   ;;  %s519_s2 = inlined_call_operand.vmem [shape: f32[20,1], index: 2, kind: input, shape index: {}]   ;;  %s520_s3 = inlined_call_operand.vmem [shape: f32[2,20], index: 3, kind: input, shape index: {}]   ;;  %s521_s4 = inlined_call_operand.vmem [shape: f32[2,1], index: 4, kind: input, shape index: {}]   ;;  %s522_s5 = inlined_call_operand.vmem [shape: f32[1,2], index: 5, kind: input, shape index: {}]   ;;  %s523_s6 = inlined_call_operand.<no memory space> [shape: f32[1,1], index: 6, kind: input, shape index: {}]   ;;  %s524_s7 = inlined_call_operand.hbm [shape: f32[1,8], index: 7, kind: output, shape index: {}]  }
   0x1   :  { %v12_v0 = vstv %s523_s6 }
   0x2   :  { %13 = vst [vmem:[#allocation2] sm:$0x1] %v12_v0 }
   0x3   :  { %v47_v1 = vld [vmem:[%s517_s0 + $0x78] sm:$0xff]  ;;  %vm66_vm0 = vcmask 89088   ;;  %v46_v2 = vld [vmem:[%s517_s0 + $0x70] sm:$0xff] }
   0x4   :  { %273 = vmatpush.xpose.msk.msra.mxu2 %vm66_vm0, %v47_v1  ;;  %274 = vmatpush.xpose.msk.msra.mxu3 %vm66_vm0, %v47_v1 }
   0x5   :  { %251 = vmatpush.xpose.msk.msra.mxu0 %vm66_vm0, %v47_v1 }
   0x6   :  { %14 = vsyncpa [#allocation4], 0  ;;  %v45_v3 = vld [vmem:[%s517_s0 + $0x68] sm:$0xff]  ;;  %v44_v4 = vld [vmem:[%s517_s0 + $0x60] sm:$0xff]  ;;  %v342_v10 = vmov 0   ;;  %v343_v27 = vmov 1  }
   0x7   :  { %v43_v5 = vld [vmem:[%s517_s0 + $0x58] sm:$0xff]  ;;  %v42_v6 = vld [vmem:[%s517_s0 + $0x50] sm:$0xff]  ;;  %v41_v7 = vld [vmem:[%s517_s0 + $0x48] sm:$0xff]  ;;  %308 = vset.pattern.permute.xlu0 %v342_v10  ;;  %309 = vset.pattern.permute.xlu1 %v342_v10  ;;  %vm164_vm1 = vcmask 1043456   ;;  %vm160_vm2 = vcmask 162816   ;;  %s242_s26 = sshll.u32 %s524_s7, 4  ;;  %s243_s26 = int_to_ptr.hbm [resolvable:$true] %s242_s26 }
   0x8   :  { %275 = vmatpush.xpose.msk.msra.mxu2 %vm66_vm0, %v46_v2  ;;  %276 = vmatpush.xpose.msk.msra.mxu3 %vm66_vm0, %v46_v2  ;;  %v50_v8 = vld [vmem:[%s519_s2 + $0x10] sm:$0xf]  ;;  %v40_v9 = vld [vmem:[%s517_s0 + $0x40] sm:$0xff]  ;;  %v39_v11 = vld [vmem:[%s517_s0 + $0x38] sm:$0xff] }
   0x9   :  { %252 = vmatpush.xpose.msk.msra.mxu0 %vm66_vm0, %v46_v2  ;;  %63 = vperm.xlu0 %308, %v50_v8   ;;  %v49_v12 = vld [vmem:[%s519_s2 + $0x8] sm:$0xff]  ;;  %v48_v13 = vld [vmem:[%s519_s2] sm:$0xff]  ;;  %v38_v14 = vld [vmem:[%s517_s0 + $0x30] sm:$0xff] }
   0xa   :  { %53 = vperm.xlu1 %309, %v48_v13   ;;  %v37_v15 = vld [vmem:[%s517_s0 + $0x28] sm:$0xff]  ;;  %v154_v16 = vld [vmem:[%s521_s4] sm:$0x3]  ;;  %v35_v19 = vld [vmem:[%s517_s0 + $0x18] sm:$0xff]  ;;  %310 = vset.pattern.permute.xlu2 %v343_v27 }
   0xb   :  { %v207_v17 = vld [vmem:[#allocation2] sm:$0x1]  ;;  %v34_v20 = vld [vmem:[%s517_s0 + $0x10] sm:$0xff]  ;;  %v33_v21 = vld [vmem:[%s517_s0 + $0x8] sm:$0xff] }
   0xc   :  { %277 = vmatpush.xpose.msk.msra.mxu2 %vm66_vm0, %v45_v3  ;;  %278 = vmatpush.xpose.msk.msra.mxu3 %vm66_vm0, %v45_v3  ;;  %v36_v18 = vld [vmem:[%s517_s0 + $0x20] sm:$0xff]  ;;  %v30_v23 = vld [vmem:[%s518_s1 + $0x8] sm:$0xff]  ;;  %v31_v24 = vld [vmem:[%s518_s1 + $0x10] sm:$0xf] }
   0xd   :  { %253 = vmatpush.xpose.msk.msra.mxu0 %vm66_vm0, %v45_v3  ;;  %v32_v22 = vld [vmem:[%s517_s0] sm:$0xff] }
   0xe   :  { %v29_v25 = vld [vmem:[%s518_s1] sm:$0xff] }
   0xf   :  { %v189_v26 = vld [vmem:[%s522_s5] sm:$0x1] }
  0x10   :  { %279 = vmatpush.xpose.msk.msra.mxu2 %vm66_vm0, %v44_v4  ;;  %280 = vmatpush.xpose.msk.msra.mxu3 %vm66_vm0, %v44_v4  ;;  %v153_v40 = vld [vmem:[%s520_s3] sm:$0x3]  ;;  %s344_s3 = smov [#allocation3]  }
  0x11   :  { %254 = vmatpush.xpose.msk.msra.mxu0 %vm66_vm0, %v44_v4  ;;  %58 = vperm.xlu0 %308, %v49_v12   ;;  %s240_s23 = sshll.u32 %s344_s3, 4  ;;  %s241_s23 = int_to_ptr.vmem [resolvable:$true] %s240_s23 }
  0x12   :  { %157 = vperm.xlu1 %309, %v154_v16   ;;  %198 = vperm.xlu2 %310, %v189_v26  }
  0x14   :  { %281 = vmatpush.xpose.msk.msra.mxu2 %vm66_vm0, %v43_v5  ;;  %282 = vmatpush.xpose.msk.msra.mxu3 %vm66_vm0, %v43_v5 }
  0x15   :  { %255 = vmatpush.xpose.msk.msra.mxu0 %vm66_vm0, %v43_v5 }
  0x18   :  { %283 = vmatpush.xpose.msk.msra.mxu2 %vm66_vm0, %v42_v6  ;;  %284 = vmatpush.xpose.msk.msra.mxu3 %vm66_vm0, %v42_v6 }
  0x19   :  { %256 = vmatpush.xpose.msk.msra.mxu0 %vm66_vm0, %v42_v6  ;;  %210 = vperm.xlu0 %308, %v207_v17  }
  0x1a   :  { %311 = vset.pattern.permute.xlu2 %v342_v10 }
  0x1b   :  { %192 = vperm.xlu2 %311, %v189_v26  }
  0x1c   :  { %285 = vmatpush.xpose.msk.msra.mxu2 %vm66_vm0, %v41_v7  ;;  %286 = vmatpush.xpose.msk.msra.mxu3 %vm66_vm0, %v41_v7 }
  0x1d   :  { %257 = vmatpush.xpose.msk.msra.mxu0 %vm66_vm0, %v41_v7 }
  0x20   :  { %287 = vmatpush.xpose.msk.msra.mxu2 %vm66_vm0, %v40_v9  ;;  %288 = vmatpush.xpose.msk.msra.mxu3 %vm66_vm0, %v40_v9 }
  0x21   :  { %258 = vmatpush.xpose.msk.msra.mxu0 %vm66_vm0, %v40_v9 }
  0x24   :  { %289 = vmatpush.xpose.msk.msra.mxu2 %vm66_vm0, %v39_v11  ;;  %290 = vmatpush.xpose.msk.msra.mxu3 %vm66_vm0, %v39_v11 }
  0x25   :  { %259 = vmatpush.xpose.msk.msra.mxu0 %vm66_vm0, %v39_v11 }
  0x28   :  { %291 = vmatpush.xpose.msk.msra.mxu2 %vm66_vm0, %v38_v14  ;;  %292 = vmatpush.xpose.msk.msra.mxu3 %vm66_vm0, %v38_v14 }
  0x29   :  { %260 = vmatpush.xpose.msk.msra.mxu0 %vm66_vm0, %v38_v14 }
  0x2c   :  { %293 = vmatpush.xpose.msk.msra.mxu2 %vm66_vm0, %v37_v15  ;;  %294 = vmatpush.xpose.msk.msra.mxu3 %vm66_vm0, %v37_v15 }
  0x2d   :  { %261 = vmatpush.xpose.msk.msra.mxu0 %vm66_vm0, %v37_v15 }
  0x30   :  { %295 = vmatpush.xpose.msk.msra.mxu2 %vm66_vm0, %v36_v18  ;;  %296 = vmatpush.xpose.msk.msra.mxu3 %vm66_vm0, %v36_v18 }
  0x31   :  { %262 = vmatpush.xpose.msk.msra.mxu0 %vm66_vm0, %v36_v18 }
  0x34   :  { %297 = vmatpush.xpose.msk.msra.mxu2 %vm66_vm0, %v35_v19  ;;  %298 = vmatpush.xpose.msk.msra.mxu3 %vm66_vm0, %v35_v19 }
  0x35   :  { %263 = vmatpush.xpose.msk.msra.mxu0 %vm66_vm0, %v35_v19 }
  0x38   :  { %299 = vmatpush.xpose.msk.msra.mxu2 %vm66_vm0, %v34_v20  ;;  %300 = vmatpush.xpose.msk.msra.mxu3 %vm66_vm0, %v34_v20 }
  0x39   :  { %264 = vmatpush.xpose.msk.msra.mxu0 %vm66_vm0, %v34_v20 }
  0x3c   :  { %301 = vmatpush.xpose.msk.msra.mxu2 %vm66_vm0, %v33_v21  ;;  %302 = vmatpush.xpose.msk.msra.mxu3 %vm66_vm0, %v33_v21 }
  0x3d   :  { %265 = vmatpush.xpose.msk.msra.mxu0 %vm66_vm0, %v33_v21 }
  0x40   :  { %303 = vmatpush.xpose.msk.msra.mxu2 %vm66_vm0, %v32_v22  ;;  %304 = vmatpush.xpose.msk.msra.mxu3 %vm66_vm0, %v32_v22 }
  0x41   :  { %266 = vmatpush.xpose.msk.msra.mxu0 %vm66_vm0, %v32_v22 }
  0x43   :  { %268 = vmatmul.msk.f32.vlgmr.msra.gmra.mxu2 %vm66_vm0, %v30_v23  ;;  %269 = vmatmul.msk.f32.vlgmr.msra.gmra.mxu3 %vm66_vm0, %v31_v24 }
  0x44   :  { %267 = vmatmul.msk.f32.vlgmr.msra.gmra.mxu0 %vm66_vm0, %v29_v25 }
  0x6c   :  { %v199_v41 = vpop.permute.xlu2 %198 }
  0x6d   :  { %v201_v46 = vperm.slane %v199_v41, 0 }
  0x75   :  { %v193_v44 = vpop.permute.xlu2 %192 }
  0x76   :  { %v195_v48 = vperm.slane %v193_v44, 0 }
  0x7b   :  { %v64_v28 = vpop.permute.xlu0 %63 }
  0x7c   :  { %v54_v31 = vpop.permute.xlu1 %53 }
  0x83   :  { %v59_v30 = vpop.permute.xlu0 %58 }
  0x84   :  { %v158_v42 = vpop.permute.xlu1 %157 }
  0x8b   :  { %v211_v50 = vpop.permute.xlu0 %210 }
  0x8c   :  { %v213_v53 = vperm.slane %v211_v50, 0 }
  0xc1   :  { %v141_v29 = vpop.f32.mrf.mxu0 }
  0xc2   :  { %v142_v36 = vadd.f32 %v141_v29, %v54_v31 }
  0xc4   :  { %v150_v39 = vmax.f32 %v142_v36, 0.0 }
  0xc6   :  { %v144_v32 = vpop.f32.mrf.mxu2  ;;  %v147_v33 = vpop.f32.mrf.mxu3 }
  0xc7   :  { %v145_v34 = vadd.f32 %v144_v32, %v59_v30  ;;  %v148_v35 = vadd.f32 %v147_v33, %v64_v28 }
  0xc9   :  { %v152_v37 = vmax.f32 %v148_v35, 0.0  ;;  %v151_v38 = vmax.f32 %v145_v34, 0.0 }
  0xcb   :  { %270 = vmatpush.msk.msra.mxu1 %vm164_vm1, %v152_v37 }
  0xcd   :  { %182 = vmatpush.msra.mxu1 %v151_v38 }
  0xcf   :  { %183 = vmatpush.msra.mxu1 %v150_v39 }
  0xd0   :  { %271 = vmatmul.msk.f32.vlgmr.msra.gmra.mxu1 %vm160_vm2, %v153_v40 }
 0x14d   :  { %v185_v43 = vpop.f32.mrf.mxu1 }
 0x14e   :  { %v186_v45 = vadd.f32 %v185_v43, %v158_v42 }
 0x150   :  { %v188_v47 = vmax.f32 %v186_v45, 0.0 }
 0x152   :  { %v202_v49 = vmul.f32 %v201_v46, %v188_v47  ;;  %v196_v52 = vmul.f32 %v195_v48, %v188_v47 }
 0x154   :  { %v204_v51 = vrot.slane %v202_v49, 1 }
 0x156   :  { %v206_v54 = vadd.f32 %v204_v51, %v196_v52 }
 0x158   :  { %v214_v55 = vadd.f32 %v213_v53, %v206_v54 }
 0x15a   :  { %v272_v56 = vmul.f32 -1.442695, %v214_v55 }
 0x15c   :  { %312 = vpow2.f32 %v272_v56 }
 0x162   :  { %v313_v57 = vpop.eup %312 }
 0x163   :  { %v218_v58 = vadd.f32 1.0, %v313_v57 }
 0x165   :  { %314 = vrcp.f32 %v218_v58  ;;  %v230_v62 = vand.u32 2147483648, %v218_v58  ;;  %v228_v0 = vand.u32 2147483647, %v218_v58  ;;  %vm224_vm4 = vweird.f32 %v218_v58 }
 0x167   :  { %v231_v2 = vor.u32 1.1754944e-38, %v230_v62  ;;  %vm229_vm6 = vcmp.eq.f32.partialorder %v228_v0, 8.507059e+37 }
 0x16b   :  { %v315_v59 = vpop.eup %314 }
 0x16c   :  { %v220_v60 = vmul.f32 %v315_v59, %v218_v58  ;;  %vm225_vm3 = vweird.f32 %v315_v59 }
 0x16d   :  { %vm226_vm5 = vmor %vm224_vm4, %vm225_vm3 }
 0x16e   :  { %v221_v61 = vsub.f32 1.0, %v220_v60 }
 0x170   :  { %v222_v63 = vmul.f32 %v315_v59, %v221_v61 }
 0x172   :  { %v223_v1 = vadd.f32 %v315_v59, %v222_v63 }
 0x174   :  { %v227_v3 = vsel %vm226_vm5, %v315_v59, %v223_v1 }
 0x175   :  { %v232_v4 = vsel %vm229_vm6, %v231_v2, %v227_v3 }
 0x176   :  { %234 = vst [vmem:[#allocation3] sm:$0x1] %v232_v4 }
 0x177   :  { %245 = dma.vmem_to_hbm [thread:$0]  %s241_s23, 16, %s243_s26, [#allocation4]  }
 0x178   :  { %340 = dma.done.wait [#allocation4], 16  }
 0x179   :  { %341 = vsyncadd [#allocation4], 4294967280 }
 0x17a   :  { %250 = vsyncpa [#allocation4], 1 }

</bundles_post_ra>
